<compile_context>
chip_gen: v6e
topology: v6e:2x2x1
jax: 0.10.0
libtpu: 0.0.40
codegen_flags: <defaults>
</compile_context>

<pallas_src>
import functools

import jax
import jax.numpy as jnp
from jax.experimental import pallas as pl
from jax.experimental.pallas import tpu as pltpu


# ------------------------------- helpers --------------------------------------
def _round_up(v, m):
    return (v + m - 1) // m * m


def _tpu_tuning(compute_dtype):
    """Generation-aware tile / scoped-VMEM budgets."""
    try:
        kind = jax.devices()[0].device_kind.lower()
    except Exception:
        kind = ""
    if "v5" in kind or "v6" in kind:
        # 128 MiB VMEM per TensorCore: large tiles, generous scoped-VMEM limit.
        return dict(tm_max=512, tn_max=4096, vmem_cap=100 << 20)
    # v7x (64 MiB VMEM / TC) or unknown: conservative budgets; wide weight tiles only
    # when weights are <= 2 bytes/elem.
    tn_max = 2048 if jnp.dtype(compute_dtype).itemsize <= 2 else 1024
    return dict(tm_max=256, tn_max=tn_max, vmem_cap=48 << 20)


def _pick_tn_and_pad(n128, tn_max):
    """Choose the weight N tile.  Prefer a 128-multiple divisor of n128; if none of a
    decent size exists, pad N up to a multiple of tn_max instead of collapsing to 128."""
    if n128 <= tn_max:
        return n128, n128
    best = 0
    d = 128
    while d <= tn_max:
        if n128 % d == 0:
            best = d
        d += 128
    if best >= max(512, tn_max // 2):
        return best, n128
    return tn_max, _round_up(n128, tn_max)


# ----------------------------- Pallas kernels ----------------------------------
def _deconv_collapse_kernel(x_ref, w_ref, b_ref, o_ref, *, scale, n_pad):
    # x_ref: (tm, H)  w_ref: (H, n_pad)  b_ref: (1, n_pad)  o_ref: (tm, scale*n_pad)
    # One matmul + bias add per row tile; the nearest-neighbour upsample is realized by
    # re-storing the same tile into each of the `scale` column blocks (store-only work).
    acc = jnp.dot(x_ref[...], w_ref[...], preferred_element_type=jnp.float32)
    acc = (acc + b_ref[...]).astype(o_ref.dtype)
    for j in range(scale):
        o_ref[:, j * n_pad:(j + 1) * n_pad] = acc


def _deconv_tiled_kernel(x_ref, w_ref, b_ref, o_ref, acc_ref):
    # Grid (rows, n_tiles, scale).  Matmul + bias once at j == 0; j > 0 steps are pure
    # cast+store re-emits of the accumulated tile (the upsample replication).
    @pl.when(pl.program_id(2) == 0)
    def _():
        acc_ref[...] = (jnp.dot(x_ref[...], w_ref[...],
                                preferred_element_type=jnp.float32) + b_ref[...])

    o_ref[...] = acc_ref[...].astype(o_ref.dtype)


def _fused_upsample_deconv(x2d, w_flat, b_flat, *, scale, tn, out_dtype):
    """x2d: (M, H) un-upsampled rows; w_flat: (H, n_pad); b_flat: (1, n_pad).

    Returns a (m_pad, scale * n_pad) array where row m's matmul result is replicated
    into the `scale` column blocks [r*n_pad, (r+1)*n_pad), r = 0..scale-1.
    """
    M, H = x2d.shape
    Hw, n_pad = w_flat.shape
    assert H == Hw and tn % 128 == 0 and n_pad % tn == 0
    n_tiles = n_pad // tn

    tune = _tpu_tuning(w_flat.dtype)
    tm_max, vmem_cap = tune["tm_max"], tune["vmem_cap"]

    bx = jnp.dtype(x2d.dtype).itemsize
    bw = jnp.dtype(w_flat.dtype).itemsize
    bo = jnp.dtype(out_dtype).itemsize

    # Balanced row tiling: rows are padded by < tm (not up to tm_max).
    n_row_tiles = pl.cdiv(M, tm_max)
    if n_row_tiles == 1 and M >= 256:
        n_row_tiles = 2  # give v7x's second TensorCore something to do
    tm = _round_up(pl.cdiv(M, n_row_tiles), 8)

    def vmem_est(tm_, collapse):
        out_cols = scale * n_pad if collapse else tn
        e = 2 * (tm_ * H * bx + H * tn * bw + tn * 4 + tm_ * out_cols * bo)
        if not collapse:
            e += tm_ * tn * 4  # f32 accumulator scratch
        return e

    collapse_j = (n_tiles == 1)
    while tm > 8 and vmem_est(tm, collapse_j) > vmem_cap:
        tm = _round_up(tm // 2, 8)
    if collapse_j and vmem_est(tm, True) > vmem_cap:
        collapse_j = False  # wide collapsed output tile does not fit; use the j grid axis
        while tm > 8 and vmem_est(tm, False) > vmem_cap:
            tm = _round_up(tm // 2, 8)

    m_pad = _round_up(M, tm)
    n_row_tiles = m_pad // tm
    if m_pad != M:
        x2d = jnp.pad(x2d, ((0, m_pad - M), (0, 0)))

    vmem_limit = int(min(vmem_cap, max(32 << 20, vmem_est(tm, collapse_j) + (8 << 20))))
    cost = pl.CostEstimate(
        flops=2 * m_pad * H * n_pad,  # matmul done once per (row, n) tile
        transcendentals=0,
        bytes_accessed=(m_pad * H * bx + n_row_tiles * H * n_pad * bw + n_pad * 4
                        + m_pad * scale * n_pad * bo),
    )

    if collapse_j:
        grid = (n_row_tiles,)
        kernel = functools.partial(_deconv_collapse_kernel, scale=scale, n_pad=n_pad)
        in_specs = [
            pl.BlockSpec((tm, H), lambda i: (i, 0)),
            pl.BlockSpec((H, n_pad), lambda i: (0, 0)),
            pl.BlockSpec((1, n_pad), lambda i: (0, 0)),
        ]
        out_specs = pl.BlockSpec((tm, scale * n_pad), lambda i: (i, 0))
        scratch = []
        dims = ("parallel",)
    else:
        grid = (n_row_tiles, n_tiles, scale)
        kernel = _deconv_tiled_kernel
        in_specs = [
            pl.BlockSpec((tm, H), lambda i, n, j: (i, 0)),
            pl.BlockSpec((H, tn), lambda i, n, j: (0, n)),
            pl.BlockSpec((1, tn), lambda i, n, j: (0, n)),
        ]
        out_specs = pl.BlockSpec((tm, tn), lambda i, n, j: (i, j * n_tiles + n))
        scratch = [pltpu.VMEM((tm, tn), jnp.float32)]
        dims = ("parallel", "parallel", "arbitrary")

    return pl.pallas_call(
        kernel,
        out_shape=jax.ShapeDtypeStruct((m_pad, scale * n_pad), out_dtype),
        grid_spec=pltpu.PrefetchScalarGridSpec(
            num_scalar_prefetch=0,
            grid=grid,
            in_specs=in_specs,
            out_specs=out_specs,
            scratch_shapes=scratch,
        ),
        compiler_params=pltpu.CompilerParams(
            dimension_semantics=dims,
            vmem_limit_bytes=vmem_limit,
        ),
        cost_estimate=cost,
    )(x2d, w_flat, b_flat)


# ----------------------------- Decoder wrapper --------------------------------
def validate_dcnn_hparams(seq_len, cnn_kernel, cnn_stride, mp_kernel, mp_stride,
                          upsample_scale, deconv_kernel, deconv_stride):
    lhs = (seq_len + deconv_stride - deconv_kernel) / (upsample_scale * deconv_stride)
    rhs = ((seq_len - cnn_kernel) / cnn_stride - mp_kernel + 1) / mp_stride + 1
    if lhs != rhs:
        raise ValueError("Invalid hyperparameter selection.")
    return int(lhs)


def prepare_decoder_params(weight, bias, *, compute_dtype=jnp.float32, tn_max=None):
    """Hoisted once per parameter update (kept out of the per-call forward path).

    weight: (hidden_dim, input_dim, K) PyTorch ConvTranspose1d layout; bias: (input_dim,).
    Returns (w_flat, b_flat, meta):
      w_flat (h_pad, n_pad) with W_flat[c, k*Cout+o] = W[c,o,k]; H lane-aligned to 128,
      N padded so the chosen weight tile tn divides it.  b_flat (1, n_pad) in f32.
    For v5e/v6e/v7x pass compute_dtype=jnp.bfloat16 (f32 accumulation is kept in-kernel).
    """
    H, Cout, K = weight.shape
    if tn_max is None:
        tn_max = _tpu_tuning(compute_dtype)["tn_max"]
    n = K * Cout
    tn, n_pad = _pick_tn_and_pad(_round_up(n, 128), tn_max)
    h_pad = _round_up(H, 128)  # lane/contraction alignment (no-op if already aligned)

    w_flat = jnp.transpose(weight, (0, 2, 1)).reshape(H, n)
    w_flat = jnp.pad(w_flat, ((0, h_pad - H), (0, n_pad - n))).astype(compute_dtype)
    b_flat = jnp.pad(jnp.tile(bias, (K,)), (0, n_pad - n))
    b_flat = b_flat.reshape(1, n_pad).astype(jnp.float32)

    meta = dict(hidden_dim=H, h_pad=h_pad, input_dim=Cout, kernel=K,
                n=n, n_pad=n_pad, tn=tn, compute_dtype=jnp.dtype(compute_dtype))
    return w_flat, b_flat, meta


def decoder_forward(x, w_flat, b_flat, *, meta, upsample_scale, deconv_kernel,
                    deconv_stride, out_dtype=None):
    """
    x: (B, L_dec, hidden_dim) -> (B, seq_len, input_dim),
    seq_len = (L_dec*scale - 1)*deconv_stride + deconv_kernel.
    """
    # TODO(synk): overlapping taps (deconv_kernel > deconv_stride) would need a
    # scatter-add epilogue; this kernel covers the validated non-overlapping case.
    assert deconv_kernel == deconv_stride, "kernel assumes non-overlapping deconv taps"
    assert deconv_kernel == meta["kernel"]

    B, L_dec, H = x.shape
    assert H == meta["hidden_dim"]
    S, K, Cout = upsample_scale, meta["kernel"], meta["input_dim"]
    n, n_pad, h_pad = meta["n"], meta["n_pad"], meta["h_pad"]
    out_dtype = x.dtype if out_dtype is None else out_dtype

    M = B * L_dec
    x2d = x.reshape(M, H).astype(meta["compute_dtype"])
    if h_pad != H:
        x2d = jnp.pad(x2d, ((0, 0), (0, h_pad - H)))

    z = _fused_upsample_deconv(x2d, w_flat, b_flat, scale=S, tn=meta["tn"],
                               out_dtype=out_dtype)
    m_pad = z.shape[0]

    # Epilogue: tap k of upsample copy r of decoder step j lands at t = (j*S + r)*K + k.
    if m_pad == M and n_pad == n:
        # Fast path: pure metadata reshape, no extra HBM depad pass.
        return z.reshape(B, L_dec * S * K, Cout)
    z = z[:M].reshape(B, L_dec, S, n_pad)[..., :n]
    return z.reshape(B, L_dec * S * K, Cout)


# ----------------------------- Reference (pure JAX) ---------------------------
def decoder_reference(x, weight, bias, *, upsample_scale, deconv_kernel, deconv_stride):
    B, L_dec, H = x.shape
    Cout, K = weight.shape[1], weight.shape[2]
    S = deconv_stride
    x_ncl = jnp.transpose(x, (0, 2, 1))                   # (B, H, L_dec)
    x_up = jnp.repeat(x_ncl, upsample_scale, axis=2)      # (B, H, L_up)
    L_up = x_up.shape[2]
    L_out = (L_up - 1) * S + K
    P = jnp.einsum("bcl,cok->bolk", x_up, weight)         # (B, Cout, L_up, K)
    out = jnp.zeros((B, Cout, L_out), dtype=x.dtype)
    for k in range(K):
        out = out.at[:, :, k:k + L_up * S:S].add(P[:, :, :, k])
    out = out + bias[None, :, None]
    return jnp.transpose(out, (0, 2, 1))                  # (B, L_out, Cout)


# ------------------------------------ main -------------------------------------
if __name__ == "__main__":
    # Hyperparameters satisfying the module's _validate_dcnn_hparams check.
    seq_len = 16
    cnn_kernel, cnn_stride = 2, 2
    mp_kernel, mp_stride = 2, 2
    upsample_scale = 2
    deconv_kernel, deconv_stride = 2, 2
    hidden_dim, input_dim = 32, 16
    B = 3  # deliberately awkward -> exercises the padded-remainder row tile

    L_dec = validate_dcnn_hparams(seq_len, cnn_kernel, cnn_stride, mp_kernel,
                                  mp_stride, upsample_scale, deconv_kernel,
                                  deconv_stride)          # decoder input length = 4

    key = jax.random.PRNGKey(0)
    kx, kw, kb = jax.random.split(key, 3)
    x = jax.random.normal(kx, (B, L_dec, hidden_dim), dtype=jnp.float32)
    # ConvTranspose1d parameters: weight (in_ch, out_ch, K), bias (out_ch,)
    fan = hidden_dim * deconv_kernel
    bound = 1.0 / (fan ** 0.5)
    weight = jax.random.uniform(kw, (hidden_dim, input_dim, deconv_kernel),
                                dtype=jnp.float32, minval=-bound, maxval=bound)
    bias = jax.random.uniform(kb, (input_dim,), dtype=jnp.float32,
                              minval=-bound, maxval=bound)

    # Hoisted parameter preparation (once per parameter update, not per forward call).
    # f32 compute keeps the 1e-5 check vs the f32 reference; use bf16 in production.
    w_flat, b_flat, meta = prepare_decoder_params(weight, bias,
                                                  compute_dtype=jnp.float32)

    fwd = jax.jit(functools.partial(decoder_forward,
                                    meta=meta,
                                    upsample_scale=upsample_scale,
                                    deconv_kernel=deconv_kernel,
                                    deconv_stride=deconv_stride))

    out = jax.block_until_ready(fwd(x, w_flat, b_flat))
    ref = decoder_reference(x, weight, bias,
                            upsample_scale=upsample_scale,
                            deconv_kernel=deconv_kernel,
                            deconv_stride=deconv_stride)

    assert out.shape == (B, seq_len, input_dim), out.shape
    assert jnp.allclose(out, ref, atol=1e-5, rtol=1e-5), float(jnp.max(jnp.abs(out - ref)))
    print("KERNEL_OK")
</pallas_src>

<mosaic_0001>
module attributes {stable_mosaic.version = 11 : i64} {
  func.func @_deconv_collapse_kernel(%arg0: i32, %arg1: memref<16x128xf32, #tpu.memory_space<vmem>>, %arg2: memref<128x128xf32, #tpu.memory_space<vmem>>, %arg3: memref<1x128xf32, #tpu.memory_space<vmem>>, %arg4: memref<16x256xf32, #tpu.memory_space<vmem>>) attributes {dimension_semantics = [#tpu.dimension_semantics<parallel>], iteration_bounds = array<i64: 1>, scalar_prefetch = 0 : i64, scratch_operands = 0 : i64, tpu.core_type = #tpu.core_type<tc>, window_params = [{transform_indices = @transform_0, window_bounds = array<i64: 16, 128>}, {pipeline_mode = #tpu.pipeline_mode<synchronous>, transform_indices = @transform_1, window_bounds = array<i64: 128, 128>}, {pipeline_mode = #tpu.pipeline_mode<synchronous>, transform_indices = @transform_2, window_bounds = array<i64: 1, 128>}, {transform_indices = @transform_3, window_bounds = array<i64: 16, 256>}]} {
    %c0 = arith.constant 0 : index
    %c0_0 = arith.constant 0 : index
    %0 = vector.load %arg1[%c0, %c0_0] : memref<16x128xf32, #tpu.memory_space<vmem>>, vector<16x128xf32>
    %c0_1 = arith.constant 0 : index
    %c0_2 = arith.constant 0 : index
    %1 = vector.load %arg2[%c0_1, %c0_2] : memref<128x128xf32, #tpu.memory_space<vmem>>, vector<128x128xf32>
    %cst = arith.constant dense<0.000000e+00> : vector<16x128xf32>
    %2 = tpu.matmul %0, %1, %cst {dimension_numbers = #tpu.dot_dimension_numbers<[1], [0], [0], [1], [0, 0, 1, 1], [], []>} : vector<16x128xf32>, vector<128x128xf32>, vector<16x128xf32> -> vector<16x128xf32>
    %c0_3 = arith.constant 0 : index
    %c0_4 = arith.constant 0 : index
    %3 = vector.load %arg3[%c0_3, %c0_4] : memref<1x128xf32, #tpu.memory_space<vmem>>, vector<1x128xf32>
    %4 = vector.broadcast %3 : vector<1x128xf32> to vector<16x128xf32>
    %5 = arith.addf %2, %4 : vector<16x128xf32>
    %c0_5 = arith.constant 0 : index
    %c0_6 = arith.constant 0 : index
    %6 = vector.load %arg4[%c0_5, %c0_6] : memref<16x256xf32, #tpu.memory_space<vmem>>, vector<16x128xf32>
    tpu.vector_store %arg4[%c0_5, %c0_6], %5 {strides = array<i32>} : memref<16x256xf32, #tpu.memory_space<vmem>>, vector<16x128xf32>,
    %c0_7 = arith.constant 0 : index
    %c128 = arith.constant 128 : index
    %7 = vector.load %arg4[%c0_7, %c128] : memref<16x256xf32, #tpu.memory_space<vmem>>, vector<16x128xf32>
    tpu.vector_store %arg4[%c0_7, %c128], %5 {strides = array<i32>} : memref<16x256xf32, #tpu.memory_space<vmem>>, vector<16x128xf32>,
    return
  }
  func.func @transform_0(%arg0: i32) -> (i32, i32) {
    %c0_i32 = arith.constant 0 : i32
    %c0_i32_0 = arith.constant 0 : i32
    return %arg0, %c0_i32 : i32, i32
  }
  func.func @transform_1(%arg0: i32) -> (i32, i32) {
    %c0_i32 = arith.constant 0 : i32
    %c0_i32_0 = arith.constant 0 : i32
    %c0_i32_1 = arith.constant 0 : i32
    return %c0_i32, %c0_i32_0 : i32, i32
  }
  func.func @transform_2(%arg0: i32) -> (i32, i32) {
    %c0_i32 = arith.constant 0 : i32
    %c0_i32_0 = arith.constant 0 : i32
    %c0_i32_1 = arith.constant 0 : i32
    return %c0_i32, %c0_i32_0 : i32, i32
  }
  func.func @transform_3(%arg0: i32) -> (i32, i32) {
    %c0_i32 = arith.constant 0 : i32
    %c0_i32_0 = arith.constant 0 : i32
    return %arg0, %c0_i32 : i32, i32
  }
}

</mosaic_0001>

<bundles_post_ra>
// kernel: decoder_forward.1
= control target key start
LH: loop header
LB: loop body
LE: loop exit
PB: predicated region body
PF: predicated region fallthrough
CT: control target
= control target key end

     0   :  { %8 = vsyncpa [#allocation3], 0  ;;  %s216_s12 = smov [#allocation2]   ;;  %s263_s0 = inlined_call_operand.vmem [shape: f32[16,128], index: 0, kind: input, shape index: {}]   ;;  %s264_s1 = inlined_call_operand.hbm [shape: f32[128,128], index: 1, kind: input, shape index: {}]   ;;  %s265_s2 = inlined_call_operand.vmem [shape: f32[1,128], index: 2, kind: input, shape index: {}]   ;;  %s266_s3 = inlined_call_operand.vmem [shape: f32[16,256], index: 3, kind: output, shape index: {}]  }
   0x1   :  { %s16_s13 = sshll.u32 %s216_s12, 4  ;;  %s17_s13 = int_to_ptr.vmem [resolvable:$true] %s16_s13 }
   0x2   :  { %s202_s14 = scalar_lea.vmem %s17_s13, 2048  ;;  %p207_p1 = scmp.lt.s32.totalorder %s17_s13, %s17_s13 }
   0x3   :  { %p203_p0 = scmp.ne.s32.totalorder %s17_s13, %s202_s14  ;;  %p208_p2 = scmp.lt.s32.totalorder %s202_s14, %s202_s14 }
   0x5   :  { %p209_p3 = por %p208_p2, %p207_p1 }
   0x7   :  { %p210_p4 = pnand %p209_p3, %p203_p0 }
   0x9   :  { %213 = shalt.err (!%p210_p4)
}
   0xa   :  { %s217_s15 = smov 128   ;;  %s218_s16 = smov 8  }
   0xb   :  { %22 = dma.hbm_to_vmem [thread:$0]  %s264_s1, 2048, %s17_s13, [#allocation3], %s217_s15, %s217_s15, %s218_s16  }
   0xc   :  { %214 = dma.done.wait [#allocation3], 2048  }
   0xd   :  { %215 = vsyncadd [#allocation3], 4294965248  ;;  %v45_v0 = vld [vmem:[#allocation2 + $0x78] sm:$0xff]  ;;  %v44_v1 = vld [vmem:[#allocation2 + $0x70] sm:$0xff] }
   0xe   :  { %156 = vmatprep.subr.mxu0 %v45_v0  ;;  %v43_v2 = vld [vmem:[#allocation2 + $0x68] sm:$0xff]  ;;  %v42_v3 = vld [vmem:[#allocation2 + $0x60] sm:$0xff]  ;;  %v41_v5 = vld [vmem:[#allocation2 + $0x58] sm:$0xff] }
   0xf   :  { %157 = vmatpush3.msra.mxu0 %v45_v0  ;;  %v28_v4 = vld [vmem:[%s263_s0] sm:$0xff]  ;;  %v40_v6 = vld [vmem:[#allocation2 + $0x50] sm:$0xff]  ;;  %v39_v7 = vld [vmem:[#allocation2 + $0x48] sm:$0xff] }
  0x10   :  { %158 = vmatprep.subr.mxu0 %v44_v1  ;;  %188 = vmatprep.mubr.f32.mxu0 %v28_v4  ;;  %v38_v8 = vld [vmem:[#allocation2 + $0x40] sm:$0xff]  ;;  %v37_v9 = vld [vmem:[#allocation2 + $0x38] sm:$0xff]  ;;  %v36_v10 = vld [vmem:[#allocation2 + $0x30] sm:$0xff] }
  0x11   :  { %159 = vmatpush3.msra.mxu0 %v44_v1  ;;  %v35_v11 = vld [vmem:[#allocation2 + $0x28] sm:$0xff]  ;;  %v34_v12 = vld [vmem:[#allocation2 + $0x20] sm:$0xff]  ;;  %v33_v13 = vld [vmem:[#allocation2 + $0x18] sm:$0xff] }
  0x12   :  { %160 = vmatprep.subr.mxu0 %v43_v2  ;;  %v32_v14 = vld [vmem:[#allocation2 + $0x10] sm:$0xff]  ;;  %v31_v15 = vld [vmem:[#allocation2 + $0x8] sm:$0xff]  ;;  %v30_v16 = vld [vmem:[#allocation2] sm:$0xff] }
  0x13   :  { %161 = vmatpush3.msra.mxu0 %v43_v2  ;;  %v29_v17 = vld [vmem:[%s263_s0 + $0x8] sm:$0xff]  ;;  %v137_v18 = vld [vmem:[%s265_s2] ss:$0 sm:$0xff] }
  0x14   :  { %162 = vmatprep.subr.mxu0 %v42_v3 }
  0x15   :  { %163 = vmatpush3.msra.mxu0 %v42_v3 }
  0x16   :  { %164 = vmatprep.subr.mxu0 %v41_v5 }
  0x17   :  { %165 = vmatpush3.msra.mxu0 %v41_v5 }
  0x18   :  { %166 = vmatprep.subr.mxu0 %v40_v6 }
  0x19   :  { %167 = vmatpush3.msra.mxu0 %v40_v6 }
  0x1a   :  { %168 = vmatprep.subr.mxu0 %v39_v7 }
  0x1b   :  { %169 = vmatpush3.msra.mxu0 %v39_v7 }
  0x1c   :  { %170 = vmatprep.subr.mxu0 %v38_v8 }
  0x1d   :  { %171 = vmatpush3.msra.mxu0 %v38_v8 }
  0x1e   :  { %172 = vmatprep.subr.mxu0 %v37_v9 }
  0x1f   :  { %173 = vmatpush3.msra.mxu0 %v37_v9 }
  0x20   :  { %174 = vmatprep.subr.mxu0 %v36_v10 }
  0x21   :  { %175 = vmatpush3.msra.mxu0 %v36_v10 }
  0x22   :  { %176 = vmatprep.subr.mxu0 %v35_v11 }
  0x23   :  { %177 = vmatpush3.msra.mxu0 %v35_v11 }
  0x24   :  { %178 = vmatprep.subr.mxu0 %v34_v12 }
  0x25   :  { %179 = vmatpush3.msra.mxu0 %v34_v12 }
  0x26   :  { %180 = vmatprep.subr.mxu0 %v33_v13 }
  0x27   :  { %181 = vmatpush3.msra.mxu0 %v33_v13 }
  0x28   :  { %182 = vmatprep.subr.mxu0 %v32_v14 }
  0x29   :  { %183 = vmatpush3.msra.mxu0 %v32_v14 }
  0x2a   :  { %184 = vmatprep.subr.mxu0 %v31_v15 }
  0x2b   :  { %185 = vmatpush3.msra.mxu0 %v31_v15 }
  0x2c   :  { %186 = vmatprep.subr.mxu0 %v30_v16 }
  0x2d   :  { %187 = vmatpush3.msra.mxu0 %v30_v16 }
  0x2e   :  { %189 = vmatmul.mubr.f32.vlgmr.msra.gmra.mxu0 %v29_v17 }
  0xee   :  { %v190_v19 = vpop.f32.mrf.mxu0 }
  0xef   :  { %v125_v20 = vadd.f32 %v190_v19, %v137_v18 }
  0xf0   :  { %v119_v21 = vpop.f32.mrf.mxu0 }
  0xf1   :  { %129 = vst [vmem:[%s266_s3 + $0x10] sm:$0xff] %v125_v20  ;;  %131 = vst [vmem:[%s266_s3 + $0x18] sm:$0xff] %v125_v20  ;;  %v120_v22 = vadd.f32 %v137_v18, %v119_v21 }
  0xf3   :  { %128 = vst [vmem:[%s266_s3] sm:$0xff] %v120_v22  ;;  %130 = vst [vmem:[%s266_s3 + $0x8] sm:$0xff] %v120_v22 }
  0xf4   :  { %136 = vsyncpa [#allocation3], 1 }

</bundles_post_ra>
